<compile_context>
chip_gen: v5e
topology: v5e:2x2
jax: 0.10.0
libtpu: 0.0.40
codegen_flags: <defaults>
</compile_context>

<pallas_src>
import functools

import numpy as np
import jax
import jax.numpy as jnp
from jax.experimental import pallas as pl
from jax.experimental.pallas import tpu as pltpu


def _round_up(v: int, m: int) -> int:
    return ((v + m - 1) // m) * m


# --------------------------- DFT / lag-window bases ---------------------------
@functools.lru_cache(maxsize=None)
def _make_bases_np(L: int, max_shift: int):
    """Host-side (numpy) bases so rfft(n=2L) and the lag-windowed irfft become
    MXU matmuls.  Cached as numpy (host) arrays; device transfer happens in the
    wrapper, so nothing is pinned to a stale device.

    Returns:
      fwd    : (Lp, 2*Fp)  x_pad @ fwd = [Re(rfft(x, n=2L)) | Im(...)] (zero-padded)
      inv_re : (Fp, Tp)    real-part inverse basis restricted to the tau window
      inv_im : (Fp, Tp)    imag-part inverse basis restricted to the tau window
    """
    n = 2 * L
    F = n // 2 + 1
    Fp = _round_up(F, 128)          # 128-lane aligned Re/Im halves
    Lp = _round_up(L, 128)          # lane-dense input tiles
    tau = 2 * max_shift + 1
    Tp = _round_up(tau, 128)

    m = np.arange(L, dtype=np.float64)[:, None]
    k = np.arange(F, dtype=np.float64)[None, :]
    ang = 2.0 * np.pi * m * k / n
    fwd = np.zeros((Lp, 2 * Fp), np.float64)
    fwd[:L, :F] = np.cos(ang)
    fwd[:L, Fp:Fp + F] = -np.sin(ang)

    # output lag indices: cat(cc[..., -max_shift:], cc[..., :max_shift+1])
    tj = np.concatenate([np.arange(n - max_shift, n), np.arange(0, max_shift + 1)])
    wk = np.full((F,), 2.0)
    wk[0] = 1.0
    if n % 2 == 0:
        wk[-1] = 1.0                # Nyquist bin appears once in the full spectrum
    ang2 = 2.0 * np.pi * np.arange(F, dtype=np.float64)[:, None] * tj[None, :] / n
    inv_re = np.zeros((Fp, Tp), np.float64)
    inv_im = np.zeros((Fp, Tp), np.float64)
    inv_re[:F, :tau] = wk[:, None] * np.cos(ang2) / n
    inv_im[:F, :tau] = -wk[:, None] * np.sin(ang2) / n

    return (fwd.astype(np.float32), inv_re.astype(np.float32),
            inv_im.astype(np.float32), Fp, Lp, Tp, tau)


# ----------------------------------- kernel -----------------------------------
def _gcc_phat_kernel(x_ref, y_ref, fwd_ref, invre_ref, invim_ref, o_ref,
                     *, Fp, eps):
    blk = x_ref.shape[0]

    # Fused forward rfft: stack x|y along sublanes, one MXU matmul -> [Re | Im].
    xy = jnp.concatenate([x_ref[...], y_ref[...]], axis=0)          # (2*blk, Lp)
    XY = jnp.dot(xy, fwd_ref[...], preferred_element_type=jnp.float32)  # (2*blk, 2*Fp)
    X, Y = XY[:blk], XY[blk:]
    Xr, Xi = X[:, :Fp], X[:, Fp:]            # 128-lane aligned full-vreg slices
    Yr, Yi = Y[:, :Fp], Y[:, Fp:]

    # Gxy = X * conj(Y)
    Gr = Xr * Yr + Xi * Yi
    Gi = Xi * Yr - Xr * Yi

    # PHAT weighting: 1 / (|Gxy| + eps) on the EUP slot.
    # TODO(synk): approx=True has ~1e-3 rel error vs exact reciprocal; use
    # approx=False if strict bit-parity with the torch reference is required.
    phi = pl.reciprocal(jnp.sqrt(Gr * Gr + Gi * Gi) + eps, approx=True)
    Wr = (Gr * phi).astype(invre_ref.dtype)
    Wi = (Gi * phi).astype(invim_ref.dtype)

    # irfft restricted to the [-max_shift, +max_shift] lags: two accumulating
    # matmuls (no lane-dim concatenate).
    cc = (jnp.dot(Wr, invre_ref[...], preferred_element_type=jnp.float32)
          + jnp.dot(Wi, invim_ref[...], preferred_element_type=jnp.float32))
    o_ref[...] = cc.astype(o_ref.dtype)


# ---------------------------------- wrapper -----------------------------------
def gcc_phat(x, y, *, max_tau=None, eps=1e-3):
    """GCC(filt='phat', beta=None).forward(x, y).

    x, y: (..., L) with equal signal lengths; leading dims are flattened into
    rows (covers the module's dim=2/3/4 cases).  Returns (..., 2*max_shift+1).
    """
    assert x.shape[-1] == y.shape[-1], "equal x/y signal lengths assumed"
    # TODO(synk): filt in {'roth','scot','ht','cc'} and beta != None branches of
    # GCC are not implemented (default config is filt='phat', beta=None).
    lead = x.shape[:-1]
    L = x.shape[-1]
    n = 2 * L
    max_shift = n // 2 if max_tau is None else min(int(max_tau), n // 2)

    fwd_np, invre_np, invim_np, Fp, Lp, Tp, tau = _make_bases_np(L, max_shift)

    R = int(np.prod(lead)) if lead else 1

    # bf16 matmul operands only once the problem is plausibly MXU-bound; tiny
    # problems stay f32 for closest numerical parity with the torch reference.
    use_bf16 = (Lp >= 256) and (R >= 32)
    mm_dtype = jnp.bfloat16 if use_bf16 else jnp.float32
    row_align = 16 if use_bf16 else 8

    # Row tiling: one block for small batches (no serial grid loop on the
    # single-TC v5e/v6e); ~512-row tiles for large batches so the "parallel"
    # axis can shard across v7x TensorCores and stay within VMEM.
    ROW_TILE_CAP = 512
    blk = min(_round_up(max(R, row_align), row_align), ROW_TILE_CAP)
    nblk = pl.cdiv(R, blk)
    Rp = nblk * blk

    x2 = jnp.asarray(x, jnp.float32).reshape(R, L)
    y2 = jnp.asarray(y, jnp.float32).reshape(R, L)
    x2 = jnp.pad(x2, ((0, Rp - R), (0, Lp - L))).astype(mm_dtype)
    y2 = jnp.pad(y2, ((0, Rp - R), (0, Lp - L))).astype(mm_dtype)

    fwd = jnp.asarray(fwd_np, mm_dtype)
    inv_re = jnp.asarray(invre_np, mm_dtype)
    inv_im = jnp.asarray(invim_np, mm_dtype)

    isz = jnp.dtype(mm_dtype).itemsize
    # VMEM footprint estimate: double-buffered x/y/out tiles + resident bases
    # + elementwise intermediates.
    est = (2 * (2 * blk * Lp * isz) + 2 * (blk * Tp * 4)
           + 2 * (Lp * 2 * Fp + 2 * Fp * Tp) * isz
           + 10 * blk * Fp * 4)
    vmem_limit = int(min(max(2 * est, 32 << 20), 100 << 20))

    flops = 2 * (2 * Rp) * Lp * (2 * Fp) + 2 * (2 * Rp) * Fp * Tp
    bytes_acc = (2 * Rp * Lp + Lp * 2 * Fp + 2 * Fp * Tp) * isz + Rp * Tp * 4
    cost = pl.CostEstimate(flops=flops, transcendentals=2 * Rp * Fp,
                           bytes_accessed=bytes_acc)

    kern = functools.partial(_gcc_phat_kernel, Fp=Fp, eps=float(eps))
    out = pl.pallas_call(
        kern,
        out_shape=jax.ShapeDtypeStruct((Rp, Tp), jnp.float32),
        grid=(nblk,),
        in_specs=[
            pl.BlockSpec((blk, Lp), lambda i: (i, 0)),
            pl.BlockSpec((blk, Lp), lambda i: (i, 0)),
            pl.BlockSpec((Lp, 2 * Fp), lambda i: (0, 0)),
            pl.BlockSpec((Fp, Tp), lambda i: (0, 0)),
            pl.BlockSpec((Fp, Tp), lambda i: (0, 0)),
        ],
        out_specs=pl.BlockSpec((blk, Tp), lambda i: (i, 0)),
        compiler_params=pltpu.CompilerParams(
            dimension_semantics=("parallel",),
            vmem_limit_bytes=vmem_limit),
        cost_estimate=cost,
    )(x2, y2, fwd, inv_re, inv_im)

    return out[:R, :tau].reshape(*lead, tau)


# ----------------------------- pure-JAX reference ------------------------------
def gcc_phat_reference(x, y, *, max_tau=None, eps=1e-3):
    n = x.shape[-1] + y.shape[-1]
    X = jnp.fft.rfft(x, n=n)
    Y = jnp.fft.rfft(y, n=n)
    Gxy = X * jnp.conj(Y)
    phi = 1.0 / (jnp.abs(Gxy) + eps)
    cc = jnp.fft.irfft(Gxy * phi, n=n)
    max_shift = n // 2
    if max_tau is not None:
        max_shift = min(int(max_tau), max_shift)
    return jnp.concatenate([cc[..., -max_shift:], cc[..., :max_shift + 1]], axis=-1)


# ------------------------------------ main -------------------------------------
if __name__ == "__main__":
    key = jax.random.PRNGKey(0)
    kx, ky, k3x, k3y = jax.random.split(key, 4)

    # dim=2 case: batch of signal pairs — GCC(max_tau=16, dim=2, filt='phat')
    R, L, max_tau = 16, 48, 16
    x = jax.random.normal(kx, (R, L), jnp.float32)
    y = jax.random.normal(ky, (R, L), jnp.float32)
    cc = jax.block_until_ready(gcc_phat(x, y, max_tau=max_tau))
    assert cc.shape == (R, 2 * max_tau + 1), cc.shape
    assert bool(jnp.all(jnp.isfinite(cc)))
    ref = gcc_phat_reference(x, y, max_tau=max_tau)
    err = float(jnp.max(jnp.abs(cc - ref)))
    assert err < 2e-2, f"max abs err vs FFT reference: {err}"

    # dim=3-style input: extra leading dims are flattened into rows
    x3 = jax.random.normal(k3x, (2, 4, L), jnp.float32)
    y3 = jax.random.normal(k3y, (2, 4, L), jnp.float32)
    cc3 = jax.block_until_ready(gcc_phat(x3, y3, max_tau=max_tau))
    assert cc3.shape == (2, 4, 2 * max_tau + 1), cc3.shape
    ref3 = gcc_phat_reference(x3, y3, max_tau=max_tau)
    err3 = float(jnp.max(jnp.abs(cc3 - ref3)))
    assert err3 < 2e-2, f"max abs err (dim=3) vs FFT reference: {err3}"

    print("KERNEL_OK")
</pallas_src>

<mosaic_0001>
module attributes {stable_mosaic.version = 11 : i64} {
  func.func @_gcc_phat_kernel(%arg0: i32, %arg1: memref<16x128xf32, #tpu.memory_space<vmem>>, %arg2: memref<16x128xf32, #tpu.memory_space<vmem>>, %arg3: memref<128x256xf32, #tpu.memory_space<vmem>>, %arg4: memref<128x128xf32, #tpu.memory_space<vmem>>, %arg5: memref<128x128xf32, #tpu.memory_space<vmem>>, %arg6: memref<16x128xf32, #tpu.memory_space<vmem>>) attributes {dimension_semantics = [#tpu.dimension_semantics<parallel>], iteration_bounds = array<i64: 1>, scalar_prefetch = 0 : i64, scratch_operands = 0 : i64, tpu.core_type = #tpu.core_type<tc>, window_params = [{transform_indices = @transform_0, window_bounds = array<i64: 16, 128>}, {transform_indices = @transform_1, window_bounds = array<i64: 16, 128>}, {pipeline_mode = #tpu.pipeline_mode<synchronous>, transform_indices = @transform_2, window_bounds = array<i64: 128, 256>}, {pipeline_mode = #tpu.pipeline_mode<synchronous>, transform_indices = @transform_3, window_bounds = array<i64: 128, 128>}, {pipeline_mode = #tpu.pipeline_mode<synchronous>, transform_indices = @transform_4, window_bounds = array<i64: 128, 128>}, {transform_indices = @transform_5, window_bounds = array<i64: 16, 128>}]} {
    %c0 = arith.constant 0 : index
    %c0_0 = arith.constant 0 : index
    %0 = vector.load %arg1[%c0, %c0_0] : memref<16x128xf32, #tpu.memory_space<vmem>>, vector<16x128xf32>
    %c0_1 = arith.constant 0 : index
    %c0_2 = arith.constant 0 : index
    %1 = vector.load %arg2[%c0_1, %c0_2] : memref<16x128xf32, #tpu.memory_space<vmem>>, vector<16x128xf32>
    %2 = tpu.concatenate %0, %1 in 0 : vector<16x128xf32>, vector<16x128xf32> -> vector<32x128xf32>
    %c0_3 = arith.constant 0 : index
    %c0_4 = arith.constant 0 : index
    %3 = vector.load %arg3[%c0_3, %c0_4] : memref<128x256xf32, #tpu.memory_space<vmem>>, vector<128x256xf32>
    %cst = arith.constant dense<0.000000e+00> : vector<32x256xf32>
    %4 = tpu.matmul %2, %3, %cst {dimension_numbers = #tpu.dot_dimension_numbers<[1], [0], [0], [1], [0, 0, 1, 1], [], []>} : vector<32x128xf32>, vector<128x256xf32>, vector<32x256xf32> -> vector<32x256xf32>
    %5 = vector.extract_strided_slice %4 {offsets = [0, 0], sizes = [16, 256], strides = [1, 1]} : vector<32x256xf32> to vector<16x256xf32>
    %6 = vector.extract_strided_slice %4 {offsets = [16, 0], sizes = [16, 256], strides = [1, 1]} : vector<32x256xf32> to vector<16x256xf32>
    %7 = vector.extract_strided_slice %5 {offsets = [0, 0], sizes = [16, 128], strides = [1, 1]} : vector<16x256xf32> to vector<16x128xf32>
    %8 = vector.extract_strided_slice %5 {offsets = [0, 128], sizes = [16, 128], strides = [1, 1]} : vector<16x256xf32> to vector<16x128xf32>
    %9 = vector.extract_strided_slice %6 {offsets = [0, 0], sizes = [16, 128], strides = [1, 1]} : vector<16x256xf32> to vector<16x128xf32>
    %10 = vector.extract_strided_slice %6 {offsets = [0, 128], sizes = [16, 128], strides = [1, 1]} : vector<16x256xf32> to vector<16x128xf32>
    %11 = arith.mulf %7, %9 : vector<16x128xf32>
    %12 = arith.mulf %8, %10 : vector<16x128xf32>
    %13 = arith.addf %11, %12 : vector<16x128xf32>
    %14 = arith.mulf %8, %9 : vector<16x128xf32>
    %15 = arith.mulf %7, %10 : vector<16x128xf32>
    %16 = arith.subf %14, %15 : vector<16x128xf32>
    %17 = arith.mulf %13, %13 : vector<16x128xf32>
    %18 = arith.mulf %16, %16 : vector<16x128xf32>
    %19 = arith.addf %17, %18 : vector<16x128xf32>
    %20 = math.sqrt %19 : vector<16x128xf32>
    %cst_5 = arith.constant 1.000000e-03 : f32
    %21 = vector.broadcast %cst_5 : f32 to vector<16x128xf32>
    %22 = arith.addf %20, %21 : vector<16x128xf32>
    %23 = tpu.reciprocal %22 {approx = true} : vector<16x128xf32> -> vector<16x128xf32>
    %24 = arith.mulf %13, %23 : vector<16x128xf32>
    %25 = arith.mulf %16, %23 : vector<16x128xf32>
    %c0_6 = arith.constant 0 : index
    %c0_7 = arith.constant 0 : index
    %26 = vector.load %arg4[%c0_6, %c0_7] : memref<128x128xf32, #tpu.memory_space<vmem>>, vector<128x128xf32>
    %cst_8 = arith.constant dense<0.000000e+00> : vector<16x128xf32>
    %27 = tpu.matmul %24, %26, %cst_8 {dimension_numbers = #tpu.dot_dimension_numbers<[1], [0], [0], [1], [0, 0, 1, 1], [], []>} : vector<16x128xf32>, vector<128x128xf32>, vector<16x128xf32> -> vector<16x128xf32>
    %c0_9 = arith.constant 0 : index
    %c0_10 = arith.constant 0 : index
    %28 = vector.load %arg5[%c0_9, %c0_10] : memref<128x128xf32, #tpu.memory_space<vmem>>, vector<128x128xf32>
    %cst_11 = arith.constant dense<0.000000e+00> : vector<16x128xf32>
    %29 = tpu.matmul %25, %28, %cst_11 {dimension_numbers = #tpu.dot_dimension_numbers<[1], [0], [0], [1], [0, 0, 1, 1], [], []>} : vector<16x128xf32>, vector<128x128xf32>, vector<16x128xf32> -> vector<16x128xf32>
    %30 = arith.addf %27, %29 : vector<16x128xf32>
    %c0_12 = arith.constant 0 : index
    %c0_13 = arith.constant 0 : index
    %31 = vector.load %arg6[%c0_12, %c0_13] : memref<16x128xf32, #tpu.memory_space<vmem>>, vector<16x128xf32>
    tpu.vector_store %arg6[%c0_12, %c0_13], %30 {strides = array<i32>} : memref<16x128xf32, #tpu.memory_space<vmem>>, vector<16x128xf32>,
    return
  }
  func.func @transform_0(%arg0: i32) -> (i32, i32) {
    %c0_i32 = arith.constant 0 : i32
    %c0_i32_0 = arith.constant 0 : i32
    return %arg0, %c0_i32 : i32, i32
  }
  func.func @transform_1(%arg0: i32) -> (i32, i32) {
    %c0_i32 = arith.constant 0 : i32
    %c0_i32_0 = arith.constant 0 : i32
    return %arg0, %c0_i32 : i32, i32
  }
  func.func @transform_2(%arg0: i32) -> (i32, i32) {
    %c0_i32 = arith.constant 0 : i32
    %c0_i32_0 = arith.constant 0 : i32
    %c0_i32_1 = arith.constant 0 : i32
    return %c0_i32, %c0_i32_0 : i32, i32
  }
  func.func @transform_3(%arg0: i32) -> (i32, i32) {
    %c0_i32 = arith.constant 0 : i32
    %c0_i32_0 = arith.constant 0 : i32
    %c0_i32_1 = arith.constant 0 : i32
    return %c0_i32, %c0_i32_0 : i32, i32
  }
  func.func @transform_4(%arg0: i32) -> (i32, i32) {
    %c0_i32 = arith.constant 0 : i32
    %c0_i32_0 = arith.constant 0 : i32
    %c0_i32_1 = arith.constant 0 : i32
    return %c0_i32, %c0_i32_0 : i32, i32
  }
  func.func @transform_5(%arg0: i32) -> (i32, i32) {
    %c0_i32 = arith.constant 0 : i32
    %c0_i32_0 = arith.constant 0 : i32
    return %arg0, %c0_i32 : i32, i32
  }
}

</mosaic_0001>

<bundles_post_ra>
// kernel: tpu_custom_call.1
= control target key start
LH: loop header
LB: loop body
LE: loop exit
PB: predicated region body
PF: predicated region fallthrough
CT: control target
= control target key end

     0   :  { %10 = vsyncpa [#allocation3], 0  ;;  %s587_s0 = inlined_call_operand.hbm [shape: f32[16,128], index: 0, kind: input, shape index: {}]   ;;  %s588_s1 = inlined_call_operand.hbm [shape: f32[16,128], index: 1, kind: input, shape index: {}]   ;;  %s589_s2 = inlined_call_operand.hbm [shape: f32[128,256], index: 2, kind: input, shape index: {}]   ;;  %s590_s3 = inlined_call_operand.hbm [shape: f32[128,128], index: 3, kind: input, shape index: {}]   ;;  %s591_s4 = inlined_call_operand.hbm [shape: f32[128,128], index: 4, kind: input, shape index: {}]   ;;  %s592_s5 = inlined_call_operand.hbm [shape: f32[16,128], index: 5, kind: output, shape index: {}]  }
   0x1   :  { %11 = vsyncpa [#allocation6], 0 }
   0x2   :  { %12 = vsyncpa [#allocation9], 0 }
   0x3   :  { %13 = vsyncpa [#allocation4], 0  ;;  %s31_s20 = sshll.u32 %s588_s1, 4  ;;  %s514_s21 = smov [#allocation5]   ;;  %s32_s20 = int_to_ptr.hbm [resolvable:$true] %s31_s20 }
   0x4   :  { %s33_s22 = sshll.u32 %s514_s21, 4  ;;  %s57_s25 = sshll.u32 %s590_s3, 4  ;;  %s34_s22 = int_to_ptr.vmem [resolvable:$true] %s33_s22  ;;  %s58_s25 = int_to_ptr.hbm [resolvable:$true] %s57_s25 }
   0x5   :  { %s515_s26 = smov 128   ;;  %s516_s27 = smov 8  }
   0x6   :  { %39 = dma.hbm_to_vmem [thread:$0]  %s32_s20, 256, %s34_s22, [#allocation6], %s515_s26, %s515_s26, %s516_s27  }
   0x7   :  { %s517_s28 = smov [#allocation8]   ;;  %s18_s1 = sshll.u32 %s587_s0, 4  ;;  %s19_s1 = int_to_ptr.hbm [resolvable:$true] %s18_s1 }
   0x8   :  { %s59_s29 = sshll.u32 %s517_s28, 4  ;;  %s44_s8 = sshll.u32 %s589_s2, 4  ;;  %s60_s29 = int_to_ptr.vmem [resolvable:$true] %s59_s29  ;;  %s45_s8 = int_to_ptr.hbm [resolvable:$true] %s44_s8 }
   0x9   :  { %65 = dma.hbm_to_vmem [thread:$0]  %s58_s25, 2048, %s60_s29, [#allocation9], %s515_s26, %s515_s26, %s516_s27  }
   0xa   :  { %s518_s9 = smov [#allocation2]   ;;  %s519_s11 = smov [#allocation7]  }
   0xb   :  { %s20_s10 = sshll.u32 %s518_s9, 4  ;;  %s46_s0 = sshll.u32 %s519_s11, 4  ;;  %s21_s10 = int_to_ptr.vmem [resolvable:$true] %s20_s10  ;;  %s47_s0 = int_to_ptr.vmem [resolvable:$true] %s46_s0 }
   0xc   :  { %26 = dma.hbm_to_vmem [thread:$0]  %s19_s1, 256, %s21_s10, [#allocation3], %s515_s26, %s515_s26, %s516_s27  }
   0xd   :  { %s520_s12 = smov 256   ;;  %s521_s13 = smov 16  }
   0xe   :  { %52 = dma.hbm_to_vmem [thread:$0]  %s45_s8, 4096, %s47_s0, [#allocation6], %s520_s12, %s520_s12, %s521_s13  }
   0xf   :  { %s70_s16 = sshll.u32 %s591_s4, 4  ;;  %s522_s2 = smov [#allocation10]   ;;  %s71_s16 = int_to_ptr.hbm [resolvable:$true] %s70_s16 }
  0x10   :  { %s72_s17 = sshll.u32 %s522_s2, 4  ;;  %s73_s17 = int_to_ptr.vmem [resolvable:$true] %s72_s17 }
  0x11   :  { %78 = dma.hbm_to_vmem [thread:$0]  %s71_s16, 2048, %s73_s17, [#allocation9], %s515_s26, %s515_s26, %s516_s27  }
  0x12   :  { %506 = dma.done.wait [#allocation3], 256  }
  0x13   :  { %507 = vsyncadd [#allocation3], 4294967040 }
  0x14   :  { %508 = dma.done.wait [#allocation6], 4352  }
  0x15   :  { %509 = vsyncadd [#allocation6], 4294962944 }
  0x16   :  { %510 = dma.done.wait [#allocation9], 4096  }
  0x17   :  { %511 = vsyncadd [#allocation9], 4294963200  ;;  %v133_v0 = vld [vmem:[#allocation7 + $0xf0] sm:$0xff]  ;;  %v134_v1 = vld [vmem:[#allocation7 + $0xf8] sm:$0xff]  ;;  %s523_s4 = smov [#allocation11]   ;;  %s329_s21 = sshll.u32 %s592_s5, 4  ;;  %s330_s21 = int_to_ptr.hbm [resolvable:$true] %s329_s21 }
  0x18   :  { %v131_v2 = vld [vmem:[#allocation7 + $0xe0] sm:$0xff]  ;;  %135 = vmatpush.msra.mxu0 %v133_v0  ;;  %164 = vmatpush.msra.mxu1 %v134_v1  ;;  %v132_v3 = vld [vmem:[#allocation7 + $0xe8] sm:$0xff]  ;;  %v129_v4 = vld [vmem:[#allocation7 + $0xd0] sm:$0xff]  ;;  %s327_s18 = sshll.u32 %s523_s4, 4  ;;  %s328_s18 = int_to_ptr.vmem [resolvable:$true] %s327_s18 }
  0x19   :  { %v130_v5 = vld [vmem:[#allocation7 + $0xd8] sm:$0xff]  ;;  %v127_v6 = vld [vmem:[#allocation7 + $0xc0] sm:$0xff]  ;;  %v128_v7 = vld [vmem:[#allocation7 + $0xc8] sm:$0xff] }
  0x1a   :  { %136 = vmatpush.msra.mxu0 %v131_v2  ;;  %165 = vmatpush.msra.mxu1 %v132_v3  ;;  %v125_v8 = vld [vmem:[#allocation7 + $0xb0] sm:$0xff]  ;;  %v126_v9 = vld [vmem:[#allocation7 + $0xb8] sm:$0xff]  ;;  %v123_v10 = vld [vmem:[#allocation7 + $0xa0] sm:$0xff] }
  0x1b   :  { %v124_v11 = vld [vmem:[#allocation7 + $0xa8] sm:$0xff]  ;;  %v121_v12 = vld [vmem:[#allocation7 + $0x90] sm:$0xff]  ;;  %v122_v13 = vld [vmem:[#allocation7 + $0x98] sm:$0xff] }
  0x1c   :  { %137 = vmatpush.msra.mxu0 %v129_v4  ;;  %166 = vmatpush.msra.mxu1 %v130_v5  ;;  %v119_v14 = vld [vmem:[#allocation7 + $0x80] sm:$0xff]  ;;  %v120_v15 = vld [vmem:[#allocation7 + $0x88] sm:$0xff]  ;;  %v117_v16 = vld [vmem:[#allocation7 + $0x70] sm:$0xff] }
  0x1d   :  { %v118_v17 = vld [vmem:[#allocation7 + $0x78] sm:$0xff]  ;;  %v115_v18 = vld [vmem:[#allocation7 + $0x60] sm:$0xff]  ;;  %v116_v19 = vld [vmem:[#allocation7 + $0x68] sm:$0xff] }
  0x1e   :  { %138 = vmatpush.msra.mxu0 %v127_v6  ;;  %167 = vmatpush.msra.mxu1 %v128_v7  ;;  %v113_v20 = vld [vmem:[#allocation7 + $0x50] sm:$0xff]  ;;  %v114_v21 = vld [vmem:[#allocation7 + $0x58] sm:$0xff]  ;;  %v111_v22 = vld [vmem:[#allocation7 + $0x40] sm:$0xff] }
  0x1f   :  { %v112_v23 = vld [vmem:[#allocation7 + $0x48] sm:$0xff]  ;;  %v109_v24 = vld [vmem:[#allocation7 + $0x30] sm:$0xff]  ;;  %v110_v25 = vld [vmem:[#allocation7 + $0x38] sm:$0xff] }
  0x20   :  { %139 = vmatpush.msra.mxu0 %v125_v8  ;;  %168 = vmatpush.msra.mxu1 %v126_v9  ;;  %v107_v26 = vld [vmem:[#allocation7 + $0x20] sm:$0xff]  ;;  %v108_v27 = vld [vmem:[#allocation7 + $0x28] sm:$0xff]  ;;  %v105_v28 = vld [vmem:[#allocation7 + $0x10] sm:$0xff] }
  0x21   :  { %v106_v29 = vld [vmem:[#allocation7 + $0x18] sm:$0xff]  ;;  %v103_v30 = vld [vmem:[#allocation7] sm:$0xff]  ;;  %v104_v31 = vld [vmem:[#allocation7 + $0x8] sm:$0xff] }
  0x22   :  { %140 = vmatpush.msra.mxu0 %v123_v10  ;;  %169 = vmatpush.msra.mxu1 %v124_v11  ;;  %v99_v32 = vld [vmem:[#allocation2] sm:$0xff]  ;;  %v100_v33 = vld [vmem:[#allocation2 + $0x8] sm:$0xff]  ;;  %v101_v34 = vld [vmem:[#allocation5] sm:$0xff] }
  0x23   :  { %v102_v35 = vld [vmem:[#allocation5 + $0x8] sm:$0xff]  ;;  %v273_v38 = vld [vmem:[#allocation10 + $0x70] sm:$0xff]  ;;  %v272_v40 = vld [vmem:[#allocation10 + $0x68] sm:$0xff] }
  0x24   :  { %141 = vmatpush.msra.mxu0 %v121_v12  ;;  %170 = vmatpush.msra.mxu1 %v122_v13  ;;  %v274_v36 = vld [vmem:[#allocation10 + $0x78] sm:$0xff]  ;;  %v257_v39 = vld [vmem:[#allocation8 + $0x70] sm:$0xff]  ;;  %v256_v41 = vld [vmem:[#allocation8 + $0x68] sm:$0xff] }
  0x25   :  { %v258_v37 = vld [vmem:[#allocation8 + $0x78] sm:$0xff]  ;;  %275 = vmatpush.msra.mxu2 %v274_v36  ;;  %v271_v42 = vld [vmem:[#allocation10 + $0x60] sm:$0xff]  ;;  %v269_v48 = vld [vmem:[#allocation10 + $0x50] sm:$0xff] }
  0x26   :  { %142 = vmatpush.msra.mxu0 %v119_v14  ;;  %171 = vmatpush.msra.mxu1 %v120_v15  ;;  %v255_v43 = vld [vmem:[#allocation8 + $0x60] sm:$0xff]  ;;  %v270_v46 = vld [vmem:[#allocation10 + $0x58] sm:$0xff]  ;;  %v253_v49 = vld [vmem:[#allocation8 + $0x50] sm:$0xff] }
  0x27   :  { %298 = vmatpush.msra.mxu3 %v258_v37  ;;  %276 = vmatpush.msra.mxu2 %v273_v38  ;;  %v254_v47 = vld [vmem:[#allocation8 + $0x58] sm:$0xff]  ;;  %v268_v50 = vld [vmem:[#allocation10 + $0x48] sm:$0xff]  ;;  %v267_v52 = vld [vmem:[#allocation10 + $0x40] sm:$0xff] }
  0x28   :  { %143 = vmatpush.msra.mxu0 %v117_v16  ;;  %172 = vmatpush.msra.mxu1 %v118_v17  ;;  %v252_v51 = vld [vmem:[#allocation8 + $0x48] sm:$0xff]  ;;  %v251_v53 = vld [vmem:[#allocation8 + $0x40] sm:$0xff]  ;;  %v266_v54 = vld [vmem:[#allocation10 + $0x38] sm:$0xff] }
  0x29   :  { %299 = vmatpush.msra.mxu3 %v257_v39  ;;  %277 = vmatpush.msra.mxu2 %v272_v40  ;;  %v250_v55 = vld [vmem:[#allocation8 + $0x38] sm:$0xff]  ;;  %v265_v58 = vld [vmem:[#allocation10 + $0x30] sm:$0xff]  ;;  %v264_v60 = vld [vmem:[#allocation10 + $0x28] sm:$0xff] }
  0x2a   :  { %144 = vmatpush.msra.mxu0 %v115_v18  ;;  %173 = vmatpush.msra.mxu1 %v116_v19  ;;  %v249_v59 = vld [vmem:[#allocation8 + $0x30] sm:$0xff]  ;;  %v248_v61 = vld [vmem:[#allocation8 + $0x28] sm:$0xff]  ;;  %v263_v62 = vld [vmem:[#allocation10 + $0x20] sm:$0xff] }
  0x2b   :  { %300 = vmatpush.msra.mxu3 %v256_v41  ;;  %278 = vmatpush.msra.mxu2 %v271_v42  ;;  %v247_v63 = vld [vmem:[#allocation8 + $0x20] sm:$0xff]  ;;  %v262_v0 = vld [vmem:[#allocation10 + $0x18] sm:$0xff]  ;;  %v261_v8 = vld [vmem:[#allocation10 + $0x10] sm:$0xff] }
  0x2c   :  { %145 = vmatpush.msra.mxu0 %v113_v20  ;;  %174 = vmatpush.msra.mxu1 %v114_v21  ;;  %v246_v1 = vld [vmem:[#allocation8 + $0x18] sm:$0xff]  ;;  %v245_v9 = vld [vmem:[#allocation8 + $0x10] sm:$0xff]  ;;  %v260_v11 = vld [vmem:[#allocation10 + $0x8] sm:$0xff] }
  0x2d   :  { %301 = vmatpush.msra.mxu3 %v255_v43  ;;  %279 = vmatpush.msra.mxu2 %v270_v46  ;;  %v244_v12 = vld [vmem:[#allocation8 + $0x8] sm:$0xff]  ;;  %v259_v15 = vld [vmem:[#allocation10] sm:$0xff] }
  0x2e   :  { %146 = vmatpush.msra.mxu0 %v111_v22  ;;  %175 = vmatpush.msra.mxu1 %v112_v23  ;;  %v243_v16 = vld [vmem:[#allocation8] sm:$0xff] }
  0x2f   :  { %302 = vmatpush.msra.mxu3 %v254_v47  ;;  %280 = vmatpush.msra.mxu2 %v269_v48 }
  0x30   :  { %147 = vmatpush.msra.mxu0 %v109_v24  ;;  %176 = vmatpush.msra.mxu1 %v110_v25 }
  0x31   :  { %303 = vmatpush.msra.mxu3 %v253_v49  ;;  %281 = vmatpush.msra.mxu2 %v268_v50 }
  0x32   :  { %148 = vmatpush.msra.mxu0 %v107_v26  ;;  %177 = vmatpush.msra.mxu1 %v108_v27 }
  0x33   :  { %304 = vmatpush.msra.mxu3 %v252_v51  ;;  %282 = vmatpush.msra.mxu2 %v267_v52 }
  0x34   :  { %149 = vmatpush.msra.mxu0 %v105_v28  ;;  %178 = vmatpush.msra.mxu1 %v106_v29 }
  0x35   :  { %305 = vmatpush.msra.mxu3 %v251_v53  ;;  %283 = vmatpush.msra.mxu2 %v266_v54 }
  0x36   :  { %150 = vmatpush.msra.mxu0 %v103_v30  ;;  %179 = vmatpush.msra.mxu1 %v104_v31 }
  0x37   :  { %151 = vmatmul.f32.vlgmr.msra.gmra.mxu0 %v99_v32  ;;  %180 = vmatmul.f32.vlgmr.msra.gmra.mxu1 %v99_v32 }
  0x38   :  { %306 = vmatpush.msra.mxu3 %v250_v55  ;;  %284 = vmatpush.msra.mxu2 %v265_v58 }
  0x3a   :  { %307 = vmatpush.msra.mxu3 %v249_v59  ;;  %285 = vmatpush.msra.mxu2 %v264_v60 }
  0x3c   :  { %308 = vmatpush.msra.mxu3 %v248_v61  ;;  %286 = vmatpush.msra.mxu2 %v263_v62 }
  0x3e   :  { %309 = vmatpush.msra.mxu3 %v247_v63  ;;  %287 = vmatpush.msra.mxu2 %v262_v0 }
  0x3f   :  { %154 = vmatmul.f32.gmra.mxu0 %v100_v33  ;;  %183 = vmatmul.f32.gmra.mxu1 %v100_v33 }
  0x40   :  { %310 = vmatpush.msra.mxu3 %v246_v1  ;;  %288 = vmatpush.msra.mxu2 %v261_v8 }
  0x42   :  { %311 = vmatpush.msra.mxu3 %v245_v9  ;;  %289 = vmatpush.msra.mxu2 %v260_v11 }
  0x44   :  { %312 = vmatpush.msra.mxu3 %v244_v12  ;;  %290 = vmatpush.msra.mxu2 %v259_v15 }
  0x46   :  { %313 = vmatpush.msra.mxu3 %v243_v16 }
  0x47   :  { %157 = vmatmul.f32.gmra.mxu0 %v101_v34  ;;  %186 = vmatmul.f32.gmra.mxu1 %v101_v34 }
  0x4f   :  { %160 = vmatmul.f32.gmra.mxu0 %v102_v35  ;;  %189 = vmatmul.f32.gmra.mxu1 %v102_v35 }
  0xb4   :  { %v152_v44 = vpop.f32.mrf.mxu0  ;;  %v181_v45 = vpop.f32.mrf.mxu1 }
  0xbc   :  { %v155_v56 = vpop.f32.mrf.mxu0  ;;  %v184_v57 = vpop.f32.mrf.mxu1 }
  0xc4   :  { %v158_v2 = vpop.f32.mrf.mxu0  ;;  %v187_v3 = vpop.f32.mrf.mxu1 }
  0xc5   :  { %v193_v4 = vmul.f32 %v158_v2, %v152_v44  ;;  %v199_v5 = vmul.f32 %v181_v45, %v158_v2  ;;  %v195_v6 = vmul.f32 %v187_v3, %v181_v45  ;;  %v201_v7 = vmul.f32 %v187_v3, %v152_v44 }
  0xc7   :  { %v197_v10 = vadd.f32 %v195_v6, %v193_v4  ;;  %v203_v13 = vsub.f32 %v199_v5, %v201_v7 }
  0xc9   :  { %v205_v14 = vmul.f32 %v197_v10, %v197_v10  ;;  %v207_v17 = vmul.f32 %v203_v13, %v203_v13 }
  0xcb   :  { %v209_v18 = vadd.f32 %v207_v17, %v205_v14 }
  0xcc   :  { %v161_v19 = vpop.f32.mrf.mxu0  ;;  %v190_v20 = vpop.f32.mrf.mxu1 }
  0xcd   :  { %v194_v21 = vmul.f32 %v161_v19, %v155_v56  ;;  %v200_v22 = vmul.f32 %v184_v57, %v161_v19  ;;  %v196_v23 = vmul.f32 %v190_v20, %v184_v57  ;;  %v202_v24 = vmul.f32 %v190_v20, %v155_v56 }
  0xce   :  { %354 = vrsqrt.f32 %v209_v18  ;;  %vm218_vm0 = vcmp.eq.f32.partialorder %v209_v18, inf  ;;  %v221_v40 = vand.u32 2147483648, %v209_v18  ;;  %vm220_vm1 = vcmp.eq.f32.partialorder %v209_v18, 0.0 }
  0xcf   :  { %v198_v25 = vadd.f32 %v196_v23, %v194_v21  ;;  %v204_v26 = vsub.f32 %v200_v22, %v202_v24 }
  0xd1   :  { %v206_v27 = vmul.f32 %v198_v25, %v198_v25  ;;  %v208_v28 = vmul.f32 %v204_v26, %v204_v26 }
  0xd3   :  { %v210_v29 = vadd.f32 %v208_v28, %v206_v27 }
  0xd4   :  { %v355_v30 = vpop.eup %354 }
  0xd5   :  { %356 = vrsqrt.f32 %v210_v29  ;;  %v212_v31 = vmul.f32 %v355_v30, %v209_v18  ;;  %vm230_vm2 = vcmp.eq.f32.partialorder %v210_v29, inf  ;;  %v233_v48 = vand.u32 2147483648, %v210_v29 }
  0xd6   :  { %vm232_vm3 = vcmp.eq.f32.partialorder %v210_v29, 0.0 }
  0xd7   :  { %v213_v32 = vmul.f32 %v355_v30, %v212_v31 }
  0xd9   :  { %v214_v33 = vmul.f32 0.5, %v213_v32 }
  0xdb   :  { %v357_v34 = vpop.eup %356  ;;  %v215_v35 = vsub.f32 1.5, %v214_v33 }
  0xdc   :  { %v224_v36 = vmul.f32 %v357_v34, %v210_v29 }
  0xdd   :  { %v216_v37 = vmul.f32 %v355_v30, %v215_v35 }
  0xde   :  { %v225_v38 = vmul.f32 %v357_v34, %v224_v36 }
  0xdf   :  { %v217_v39 = vmul.f32 %v216_v37, %v209_v18 }
  0xe0   :  { %v226_v41 = vmul.f32 0.5, %v225_v38 }
  0xe1   :  { %v219_v42 = vsel %vm218_vm0, %v209_v18, %v217_v39 }
  0xe2   :  { %v222_v43 = vsel %vm220_vm1, %v221_v40, %v219_v42  ;;  %v227_v44 = vsub.f32 1.5, %v226_v41 }
  0xe3   :  { %v235_v45 = vadd.f32 0.001, %v222_v43 }
  0xe4   :  { %v228_v46 = vmul.f32 %v357_v34, %v227_v44 }
  0xe5   :  { %358 = vrcp.f32 %v235_v45 }
  0xe6   :  { %v229_v47 = vmul.f32 %v228_v46, %v210_v29 }
  0xe8   :  { %v231_v49 = vsel %vm230_vm2, %v210_v29, %v229_v47 }
  0xe9   :  { %v234_v50 = vsel %vm232_vm3, %v233_v48, %v231_v49 }
  0xea   :  { %v236_v51 = vadd.f32 0.001, %v234_v50 }
  0xeb   :  { %v359_v52 = vpop.eup %358 }
  0xec   :  { %v241_v53 = vmul.f32 %v359_v52, %v203_v13  ;;  %v239_v54 = vmul.f32 %v359_v52, %v197_v10  ;;  %360 = vrcp.f32 %v236_v51 }
  0xee   :  { %291 = vmatmul.f32.vlgmr.msra.gmra.mxu2 %v241_v53  ;;  %314 = vmatmul.f32.vlgmr.msra.gmra.mxu3 %v239_v54 }
  0xf2   :  { %v361_v55 = vpop.eup %360 }
  0xf3   :  { %v242_v56 = vmul.f32 %v361_v55, %v204_v26  ;;  %v240_v57 = vmul.f32 %v361_v55, %v198_v25 }
  0xf6   :  { %294 = vmatmul.f32.gmra.mxu2 %v242_v56  ;;  %317 = vmatmul.f32.gmra.mxu3 %v240_v57 }
 0x171   :  { %v292_v58 = vpop.f32.mrf.mxu2  ;;  %v315_v59 = vpop.f32.mrf.mxu3 }
 0x172   :  { %v316_v60 = vadd.f32 %v315_v59, %v292_v58 }
 0x174   :  { %321 = vst [vmem:[#allocation11] sm:$0xff] %v316_v60 }
 0x179   :  { %v295_v61 = vpop.f32.mrf.mxu2  ;;  %v318_v62 = vpop.f32.mrf.mxu3 }
 0x17a   :  { %v319_v63 = vadd.f32 %v318_v62, %v295_v61 }
 0x17c   :  { %322 = vst [vmem:[#allocation11 + $0x8] sm:$0xff] %v319_v63 }
 0x17d   :  { %335 = dma.vmem_to_hbm [thread:$0]  %s328_s18, 256, %s330_s21, [#allocation4], %s515_s26, %s515_s26, %s516_s27  }
 0x17e   :  { %512 = dma.done.wait [#allocation4], 256  }
 0x17f   :  { %513 = vsyncadd [#allocation4], 4294967040 }
 0x180   :  { %340 = vsyncpa [#allocation3], 1 }
 0x181   :  { %341 = vsyncpa [#allocation6], 1 }
 0x182   :  { %342 = vsyncpa [#allocation9], 1 }
 0x183   :  { %343 = vsyncpa [#allocation4], 1 }

</bundles_post_ra>
